<compile_context>
chip_gen: v5e
topology: v5e:2x2
jax: 0.10.0
libtpu: 0.0.40
codegen_flags: <defaults>
</compile_context>

<pallas_src>
import math
import functools

import jax
import jax.numpy as jnp
from jax import lax
from jax.experimental import pallas as pl
from jax.experimental.pallas import tpu as pltpu

LN_EPS = 1e-12                 # matches nn.LayerNorm(d_model, eps=1e-12) in the reference
NEG_INF = -1e32                # matches masked_fill(mask == False, -1e+32)
ROW_TILE_TARGET = 512          # row tile for matmul / LN kernels (mem-bound roofline ~85%)


# --------------------------------------------------------------------------
# Generation-aware VMEM budget + Buffered(1) capability probe
# --------------------------------------------------------------------------
@functools.lru_cache(maxsize=None)
def _vmem_limit():
    cap = 64 * 1024 * 1024
    try:
        cap = int(getattr(pltpu.get_tpu_info(), "vmem_capacity_bytes", cap))
    except Exception:
        pass
    # Leave ~25% headroom for compiler-internal scratch; never exceed 100 MiB.
    return max(32 * 1024 * 1024, min((cap * 3) // 4, 100 * 1024 * 1024))


def _probe_copy_kernel(x_ref, o_ref):
    o_ref[...] = x_ref[...]


@functools.lru_cache(maxsize=None)
def _buffered_one_supported():
    """Check that pipeline_mode=pl.Buffered(1) lowers and runs correctly."""
    try:
        with jax.ensure_compile_time_eval():
            x = jnp.arange(8 * 128, dtype=jnp.float32).reshape(8, 128)
            y = pl.pallas_call(
                _probe_copy_kernel,
                grid=(2,),
                in_specs=[pl.BlockSpec((8, 128), lambda i: (0, 0),
                                       pipeline_mode=pl.Buffered(1))],
                out_specs=pl.BlockSpec((8, 128), lambda i: (0, 0)),
                out_shape=jax.ShapeDtypeStruct((8, 128), jnp.float32),
            )(x)
            return bool(jnp.all(y == x))
    except Exception:
        return False


def _const_spec(block_shape, index_map):
    """BlockSpec for inputs whose block index never changes: single-buffered."""
    if _buffered_one_supported():
        return pl.BlockSpec(block_shape, index_map, pipeline_mode=pl.Buffered(1))
    return pl.BlockSpec(block_shape, index_map)


def _row_tile(n, target=ROW_TILE_TARGET):
    # min(target, n) is always a legal block size: either divisible by 8 (512)
    # or equal to the full array dim.
    return min(target, n)


def _compiler_params(semantics):
    return pltpu.CompilerParams(dimension_semantics=semantics,
                                vmem_limit_bytes=_vmem_limit())


# --------------------------------------------------------------------------
# Pallas kernel bodies
# --------------------------------------------------------------------------
def _ln(h, g, b):
    # LayerNorm over last dim, biased variance (as torch), eps = 1e-12.
    mean = jnp.mean(h, axis=-1, keepdims=True)
    var = jnp.mean(jnp.square(h - mean), axis=-1, keepdims=True)
    return (h - mean) * lax.rsqrt(var + LN_EPS) * g + b


def _linear_kernel(x_ref, w_ref, b_ref, o_ref, *, dot_dtype):
    x = x_ref[...].astype(dot_dtype)
    w = w_ref[...].astype(dot_dtype)
    o_ref[...] = jnp.dot(x, w, preferred_element_type=jnp.float32) + b_ref[...]


def _proj_add_ln_kernel(x_ref, w_ref, b_ref, res_ref, g_ref, beta_ref, o_ref,
                        *, dot_dtype):
    # y = x @ Wo + bo ; out = LayerNorm(residual + y)
    x = x_ref[...].astype(dot_dtype)
    w = w_ref[...].astype(dot_dtype)
    y = jnp.dot(x, w, preferred_element_type=jnp.float32) + b_ref[...]
    # TODO(synk): dropout_sa is identity (eval-mode semantics)
    o_ref[...] = _ln(res_ref[...] + y, g_ref[...], beta_ref[...])


def _ffn_add_ln_kernel(x_ref, w1_ref, b1_ref, w2_ref, b2_ref, g_ref, beta_ref,
                       o_ref, *, dot_dtype):
    # out = LayerNorm(x + relu(x @ W1 + b1) @ W2 + b2)
    # TODO(synk): for very large d_ff add a dff grid axis ("arbitrary", f32
    # accumulator scratch) so W1/W2 need not be fully VMEM-resident on v7x.
    x = x_ref[...]
    h = jnp.dot(x.astype(dot_dtype), w1_ref[...].astype(dot_dtype),
                preferred_element_type=jnp.float32) + b1_ref[...]
    h = jnp.maximum(h, 0.0)
    y = jnp.dot(h.astype(dot_dtype), w2_ref[...].astype(dot_dtype),
                preferred_element_type=jnp.float32) + b2_ref[...]
    # TODO(synk): dropout_fc_1 / dropout_fc_2 are identity (eval-mode semantics)
    o_ref[...] = _ln(x + y, g_ref[...], beta_ref[...])


def _mha_kernel(q_ref, k_ref, v_ref, mask_ref, sin_ref, gamma_ref,
                o_ref, attn_ref, *, is_effect, dot_dtype, inv_sqrt):
    # One (batch, head) pair per grid step. q/k/v blocks are (1, S, Dh).
    h = pl.program_id(1)
    q = q_ref[0]                       # (S, Dh)
    k = k_ref[0]
    v = v_ref[0]
    mask = mask_ref[0]                 # (S, S) float 0/1

    # score = q @ k^T / sqrt(Dh)  -- contract last dims, no explicit transpose.
    score = lax.dot_general(
        q.astype(dot_dtype), k.astype(dot_dtype),
        dimension_numbers=(((1,), (1,)), ((), ())),
        preferred_element_type=jnp.float32) * inv_sqrt

    def masked_softmax(s):
        # masked_fill(mask == False, -1e32); softmax; * mask  (exact division,
        # matching torch).  Fully-masked rows give a uniform softmax that is
        # then zeroed by the multiplicative mask, exactly as in the reference.
        s = jnp.where(mask > 0.0, s, NEG_INF)
        e = jnp.exp(s - jnp.max(s, axis=-1, keepdims=True))
        p = e / jnp.sum(e, axis=-1, keepdims=True)
        return p * mask

    if is_effect:
        gamma = gamma_ref[h]                                        # scalar (SMEM)
        score_ = masked_softmax(score)
        forget = jnp.exp(-sin_ref[...] / (gamma * score_ + 1.0))    # exact divide
        score = score * forget

    p = masked_softmax(score)
    attn_ref[0, 0] = p.astype(attn_ref.dtype)
    o_ref[0] = lax.dot_general(
        p.astype(dot_dtype), v.astype(dot_dtype),
        dimension_numbers=(((1,), (0,)), ((), ())),
        preferred_element_type=jnp.float32).astype(o_ref.dtype)


# --------------------------------------------------------------------------
# Pallas wrappers
# --------------------------------------------------------------------------
def linear(x, w, b, *, dot_dtype=jnp.bfloat16):
    n, din = x.shape
    dout = w.shape[1]
    tile = _row_tile(n)
    return pl.pallas_call(
        functools.partial(_linear_kernel, dot_dtype=dot_dtype),
        grid=(pl.cdiv(n, tile),),
        out_shape=jax.ShapeDtypeStruct((n, dout), jnp.float32),
        in_specs=[
            pl.BlockSpec((tile, din), lambda i: (i, 0)),
            _const_spec((din, dout), lambda i: (0, 0)),
            _const_spec((1, dout), lambda i: (0, 0)),
        ],
        out_specs=pl.BlockSpec((tile, dout), lambda i: (i, 0)),
        compiler_params=_compiler_params(("parallel",)),
    )(x, w, b)


def proj_add_layernorm(x, w, b, residual, g, beta, *, dot_dtype=jnp.bfloat16):
    n, din = x.shape
    dout = w.shape[1]
    tile = _row_tile(n)
    return pl.pallas_call(
        functools.partial(_proj_add_ln_kernel, dot_dtype=dot_dtype),
        grid=(pl.cdiv(n, tile),),
        out_shape=jax.ShapeDtypeStruct((n, dout), jnp.float32),
        in_specs=[
            pl.BlockSpec((tile, din), lambda i: (i, 0)),
            _const_spec((din, dout), lambda i: (0, 0)),
            _const_spec((1, dout), lambda i: (0, 0)),
            pl.BlockSpec((tile, dout), lambda i: (i, 0)),
            _const_spec((1, dout), lambda i: (0, 0)),
            _const_spec((1, dout), lambda i: (0, 0)),
        ],
        out_specs=pl.BlockSpec((tile, dout), lambda i: (i, 0)),
        compiler_params=_compiler_params(("parallel",)),
    )(x, w, b, residual, g, beta)


def ffn_add_layernorm(x, w1, b1, w2, b2, g, beta, *, dot_dtype=jnp.bfloat16):
    n, d = x.shape
    dff = w1.shape[1]
    tile = _row_tile(n)
    return pl.pallas_call(
        functools.partial(_ffn_add_ln_kernel, dot_dtype=dot_dtype),
        grid=(pl.cdiv(n, tile),),
        out_shape=jax.ShapeDtypeStruct((n, d), jnp.float32),
        in_specs=[
            pl.BlockSpec((tile, d), lambda i: (i, 0)),
            _const_spec((d, dff), lambda i: (0, 0)),
            _const_spec((1, dff), lambda i: (0, 0)),
            _const_spec((dff, d), lambda i: (0, 0)),
            _const_spec((1, d), lambda i: (0, 0)),
            _const_spec((1, d), lambda i: (0, 0)),
            _const_spec((1, d), lambda i: (0, 0)),
        ],
        out_specs=pl.BlockSpec((tile, d), lambda i: (i, 0)),
        compiler_params=_compiler_params(("parallel",)),
    )(x, w1, b1, w2, b2, g, beta)


def attention_pallas(srcs, offs, mask_f, sin_rel, gamma, *, B, S, H, Dh,
                     fused_heads, is_effect, dot_dtype=jnp.bfloat16,
                     attn_dtype=jnp.float32):
    """Per-(batch, head) attention.

    fused_heads=True : srcs are (B, S, W) arrays; head h of input t lives at
                       column-block offs[t] + h (block width Dh); output is
                       written directly in (B, S, H*Dh) layout.
    fused_heads=False: srcs are (B*H, S, Dh) arrays; output is (B*H, S, Dh).
    """
    D = H * Dh
    if fused_heads:
        def mk_spec(off):
            return pl.BlockSpec((1, S, Dh), lambda b, h: (b, 0, off + h))
        qkv_specs = [mk_spec(offs[0]), mk_spec(offs[1]), mk_spec(offs[2])]
        o_shape = jax.ShapeDtypeStruct((B, S, D), jnp.float32)
        o_spec = pl.BlockSpec((1, S, Dh), lambda b, h: (b, 0, h))
    else:
        def mk_spec(_):
            return pl.BlockSpec((1, S, Dh), lambda b, h: (b * H + h, 0, 0))
        qkv_specs = [mk_spec(0), mk_spec(0), mk_spec(0)]
        o_shape = jax.ShapeDtypeStruct((B * H, S, Dh), jnp.float32)
        o_spec = pl.BlockSpec((1, S, Dh), lambda b, h: (b * H + h, 0, 0))

    kernel = functools.partial(_mha_kernel, is_effect=is_effect,
                               dot_dtype=dot_dtype,
                               inv_sqrt=1.0 / math.sqrt(Dh))
    # TODO(synk): for very long S, add flash-style q/kv tiling; note the module
    # must still return the full (S,S) attention matrix, so HBM stays O(S^2).
    return pl.pallas_call(
        kernel,
        grid=(B, H),
        out_shape=(o_shape, jax.ShapeDtypeStruct((B, H, S, S), attn_dtype)),
        in_specs=qkv_specs + [
            pl.BlockSpec((1, S, S), lambda b, h: (b, 0, 0)),    # mask (0/1)
            _const_spec((S, S), lambda b, h: (0, 0)),           # sin(rel/40)
            pl.BlockSpec(memory_space=pltpu.MemorySpace.SMEM),  # per-head gamma
        ],
        out_specs=(o_spec,
                   pl.BlockSpec((1, 1, S, S), lambda b, h: (b, h, 0, 0))),
        compiler_params=_compiler_params(("parallel", "parallel")),
    )(srcs[0], srcs[1], srcs[2], mask_f, sin_rel, gamma)


# --------------------------------------------------------------------------
# Parameter init (deterministic, mirrors nn.Module shapes)
# --------------------------------------------------------------------------
def _xavier_uniform(key, fan_out, fan_in):
    a = math.sqrt(6.0 / (fan_in + fan_out))
    w = jax.random.uniform(key, (fan_out, fan_in), jnp.float32, -a, a)
    return w.T  # stored as (Din, Dout) so kernels do x @ w


def init_params(key, d_model, d_q, d_k, d_v, n_heads, d_ff):
    ks = jax.random.split(key, 6)
    p = {
        "n_heads": n_heads,
        "wq": _xavier_uniform(ks[0], d_model, d_q),
        "bq": jnp.zeros((1, d_model), jnp.float32),
        "wk": _xavier_uniform(ks[1], d_model, d_k),
        "bk": jnp.zeros((1, d_model), jnp.float32),
        "wv": _xavier_uniform(ks[2], d_model, d_v),
        "bv": jnp.zeros((1, d_model), jnp.float32),
        "wo": _xavier_uniform(ks[3], d_model, d_model),
        "bo": jnp.zeros((1, d_model), jnp.float32),
        "gamma": jnp.ones((1, n_heads, 1, 1), jnp.float32),
        "ln1_g": jnp.ones((1, d_model), jnp.float32),
        "ln1_b": jnp.zeros((1, d_model), jnp.float32),
        # deterministic synthetic init (torch default init for FFN linears differs)
        "w1": _xavier_uniform(ks[4], d_ff, d_model),
        "b1": jnp.zeros((1, d_ff), jnp.float32),
        "w2": _xavier_uniform(ks[5], d_model, d_ff),
        "b2": jnp.zeros((1, d_model), jnp.float32),
        "ln2_g": jnp.ones((1, d_model), jnp.float32),
        "ln2_b": jnp.zeros((1, d_model), jnp.float32),
    }
    if d_q == d_k == d_v:
        # fused QKV weight for the self-attention fast path
        p["w_qkv"] = jnp.concatenate([p["wq"], p["wk"], p["wv"]], axis=1)
        p["b_qkv"] = jnp.concatenate([p["bq"], p["bk"], p["bv"]], axis=1)
    return p


# --------------------------------------------------------------------------
# Forward pass of TransformerEncoderLayer
# --------------------------------------------------------------------------
def _normalize_mask(mask, B, S):
    m = jnp.asarray(mask).astype(jnp.float32)
    if m.ndim == 4:
        # TODO(synk): per-head masks unsupported; head dim assumed broadcast.
        m = m[:, 0]
    elif m.ndim == 2:
        m = m[None]
    return jnp.broadcast_to(m, (B, S, S))


def _to_heads(x2d, B, S, H, Dh):
    return x2d.reshape(B, S, H, Dh).transpose(0, 2, 1, 3).reshape(B * H, S, Dh)


def transformer_encoder_layer(params, q, k, v, mask, *, is_effect=True,
                              dot_dtype=jnp.bfloat16, attn_dtype=jnp.float32,
                              query_equals_key=None):
    B, S, _ = q.shape
    H = params["n_heads"]
    D = params["wo"].shape[0]          # d_model
    Dh = D // H
    N = B * S
    q_flat = q.reshape(N, -1)          # residual (requires d_q == d_model, as in torch)

    self_attn = (q is k) and (k is v) and ("w_qkv" in params)
    fused_heads = (Dh % 128 == 0)      # lane-aligned per-head column slicing

    # --- Q/K/V projections (fused into one wide matmul for self-attention) ---
    if self_attn:
        qkv = linear(q_flat, params["w_qkv"], params["b_qkv"], dot_dtype=dot_dtype)
        qp = kp = vp = None
    else:
        qp = linear(q.reshape(N, -1), params["wq"], params["bq"], dot_dtype=dot_dtype)
        kp = linear(k.reshape(N, -1), params["wk"], params["bk"], dot_dtype=dot_dtype)
        vp = linear(v.reshape(N, -1), params["wv"], params["bv"], dot_dtype=dot_dtype)
        qkv = None

    if fused_heads:
        if self_attn:
            src = qkv.reshape(B, S, 3 * D)
            srcs, offs = (src, src, src), (0, H, 2 * H)
        else:
            srcs = (qp.reshape(B, S, D), kp.reshape(B, S, D), vp.reshape(B, S, D))
            offs = (0, 0, 0)
    else:
        # Fallback for Dh not a multiple of 128: explicit head transpose.
        if self_attn:
            qp, kp, vp = jnp.split(qkv, 3, axis=-1)
        srcs = (_to_heads(qp, B, S, H, Dh), _to_heads(kp, B, S, H, Dh),
                _to_heads(vp, B, S, H, Dh))
        offs = (0, 0, 0)

    # --- mask as a single (B,S,S) 0/1 stream (bias derived in-kernel) ---
    mask_f = _normalize_mask(mask, B, S)

    # --- relation position table (trace-time branch; the reference evaluates
    #     torch.equal on the *projected* q/k, which is effectively always False
    #     when Wq != Wk — pass query_equals_key=True to force the other table).
    if query_equals_key is None:
        query_equals_key = False
    idx = jnp.arange(S, dtype=jnp.float32)
    absdiff = jnp.abs(idx[None, :] - idx[:, None])
    rel = jnp.minimum(absdiff, 40.0) if query_equals_key \
        else jnp.minimum(absdiff, 39.0) + 1.0
    sin_rel = jnp.sin(rel / 40.0)

    gamma = params["gamma"].reshape(H)

    attended, attn = attention_pallas(
        srcs, offs, mask_f, sin_rel, gamma,
        B=B, S=S, H=H, Dh=Dh, fused_heads=fused_heads, is_effect=is_effect,
        dot_dtype=dot_dtype, attn_dtype=attn_dtype)

    if fused_heads:
        attended2d = attended.reshape(N, D)     # already (B, S, H*Dh) layout
    else:
        attended2d = attended.reshape(B, H, S, Dh).transpose(0, 2, 1, 3).reshape(N, D)

    # --- output projection + residual + LayerNorm (fused) ---
    h1 = proj_add_layernorm(attended2d, params["wo"], params["bo"], q_flat,
                            params["ln1_g"], params["ln1_b"], dot_dtype=dot_dtype)

    # --- FFN + residual + LayerNorm (fused) ---
    out = ffn_add_layernorm(h1, params["w1"], params["b1"],
                            params["w2"], params["b2"],
                            params["ln2_g"], params["ln2_b"], dot_dtype=dot_dtype)

    return out.reshape(B, S, D), attn


# --------------------------------------------------------------------------
if __name__ == "__main__":
    B, S = 2, 16
    d_model = d_q = d_k = d_v = 256
    n_heads = 2                      # Dh = 128 -> lane-aligned fused-head path
    d_ff = 512

    root = jax.random.PRNGKey(0)
    k_x, k_p = jax.random.split(root)

    x = jax.random.normal(k_x, (B, S, d_model), jnp.float32)
    mask = jnp.tril(jnp.ones((S, S), dtype=bool))[None, None]   # causal (1,1,S,S)

    params = init_params(k_p, d_model, d_q, d_k, d_v, n_heads, d_ff)

    out, attn = transformer_encoder_layer(params, x, x, x, mask, is_effect=True,
                                          dot_dtype=jnp.bfloat16)
    jax.block_until_ready((out, attn))

    assert out.shape == (B, S, d_model)
    assert attn.shape == (B, n_heads, S, S)
    assert bool(jnp.all(jnp.isfinite(out))) and bool(jnp.all(jnp.isfinite(attn)))
    print("KERNEL_OK")
</pallas_src>

<mosaic_0001>
module attributes {stable_mosaic.version = 11 : i64} {
  func.func @_probe_copy_kernel(%arg0: i32, %arg1: memref<8x128xf32, #tpu.memory_space<vmem>>, %arg2: memref<8x128xf32, #tpu.memory_space<vmem>>) attributes {dimension_semantics = [#tpu.dimension_semantics<arbitrary>], iteration_bounds = array<i64: 2>, scalar_prefetch = 0 : i64, scratch_operands = 0 : i64, tpu.core_type = #tpu.core_type<tc>, window_params = [{pipeline_mode = #tpu.pipeline_mode<synchronous>, transform_indices = @transform_0, window_bounds = array<i64: 8, 128>}, {pipeline_mode = #tpu.pipeline_mode<synchronous>, transform_indices = @transform_1, window_bounds = array<i64: 8, 128>}]} {
    %c0 = arith.constant 0 : index
    %c0_0 = arith.constant 0 : index
    %0 = vector.load %arg1[%c0, %c0_0] : memref<8x128xf32, #tpu.memory_space<vmem>>, vector<8x128xf32>
    %c0_1 = arith.constant 0 : index
    %c0_2 = arith.constant 0 : index
    %1 = vector.load %arg2[%c0_1, %c0_2] : memref<8x128xf32, #tpu.memory_space<vmem>>, vector<8x128xf32>
    tpu.vector_store %arg2[%c0_1, %c0_2], %0 {strides = array<i32>} : memref<8x128xf32, #tpu.memory_space<vmem>>, vector<8x128xf32>,
    return
  }
  func.func @transform_0(%arg0: i32) -> (i32, i32) {
    %c0_i32 = arith.constant 0 : i32
    %c0_i32_0 = arith.constant 0 : i32
    %c0_i32_1 = arith.constant 0 : i32
    return %c0_i32, %c0_i32_0 : i32, i32
  }
  func.func @transform_1(%arg0: i32) -> (i32, i32) {
    %c0_i32 = arith.constant 0 : i32
    %c0_i32_0 = arith.constant 0 : i32
    %c0_i32_1 = arith.constant 0 : i32
    return %c0_i32, %c0_i32_0 : i32, i32
  }
}

module attributes {stable_mosaic.version = 11 : i64} {
  func.func @_linear_kernel(%arg0: i32, %arg1: memref<32x256xf32, #tpu.memory_space<vmem>>, %arg2: memref<256x768xf32, #tpu.memory_space<vmem>>, %arg3: memref<1x768xf32, #tpu.memory_space<vmem>>, %arg4: memref<32x768xf32, #tpu.memory_space<vmem>>) attributes {dimension_semantics = [#tpu.dimension_semantics<parallel>], iteration_bounds = array<i64: 1>, scalar_prefetch = 0 : i64, scratch_operands = 0 : i64, tpu.core_type = #tpu.core_type<tc>, window_params = [{transform_indices = @transform_0, window_bounds = array<i64: 32, 256>}, {pipeline_mode = #tpu.pipeline_mode<synchronous>, transform_indices = @transform_1, window_bounds = array<i64: 256, 768>}, {pipeline_mode = #tpu.pipeline_mode<synchronous>, transform_indices = @transform_2, window_bounds = array<i64: 1, 768>}, {transform_indices = @transform_3, window_bounds = array<i64: 32, 768>}]} {
    %c0 = arith.constant 0 : index
    %c0_0 = arith.constant 0 : index
    %0 = vector.load %arg1[%c0, %c0_0] : memref<32x256xf32, #tpu.memory_space<vmem>>, vector<32x256xf32>
    %1 = arith.truncf %0 : vector<32x256xf32> to vector<32x256xbf16>
    %c0_1 = arith.constant 0 : index
    %c0_2 = arith.constant 0 : index
    %2 = vector.load %arg2[%c0_1, %c0_2] : memref<256x768xf32, #tpu.memory_space<vmem>>, vector<256x768xf32>
    %3 = arith.truncf %2 : vector<256x768xf32> to vector<256x768xbf16>
    %cst = arith.constant dense<0.000000e+00> : vector<32x768xf32>
    %4 = tpu.matmul %1, %3, %cst {dimension_numbers = #tpu.dot_dimension_numbers<[1], [0], [0], [1], [0, 0, 1, 1], [], []>} : vector<32x256xbf16>, vector<256x768xbf16>, vector<32x768xf32> -> vector<32x768xf32>
    %c0_3 = arith.constant 0 : index
    %c0_4 = arith.constant 0 : index
    %5 = vector.load %arg3[%c0_3, %c0_4] : memref<1x768xf32, #tpu.memory_space<vmem>>, vector<1x768xf32>
    %6 = vector.broadcast %5 : vector<1x768xf32> to vector<32x768xf32>
    %7 = arith.addf %4, %6 : vector<32x768xf32>
    %c0_5 = arith.constant 0 : index
    %c0_6 = arith.constant 0 : index
    %8 = vector.load %arg4[%c0_5, %c0_6] : memref<32x768xf32, #tpu.memory_space<vmem>>, vector<32x768xf32>
    tpu.vector_store %arg4[%c0_5, %c0_6], %7 {strides = array<i32>} : memref<32x768xf32, #tpu.memory_space<vmem>>, vector<32x768xf32>,
    return
  }
  func.func @transform_0(%arg0: i32) -> (i32, i32) {
    %c0_i32 = arith.constant 0 : i32
    %c0_i32_0 = arith.constant 0 : i32
    return %arg0, %c0_i32 : i32, i32
  }
  func.func @transform_1(%arg0: i32) -> (i32, i32) {
    %c0_i32 = arith.constant 0 : i32
    %c0_i32_0 = arith.constant 0 : i32
    %c0_i32_1 = arith.constant 0 : i32
    return %c0_i32, %c0_i32_0 : i32, i32
  }
  func.func @transform_2(%arg0: i32) -> (i32, i32) {
    %c0_i32 = arith.constant 0 : i32
    %c0_i32_0 = arith.constant 0 : i32
    %c0_i32_1 = arith.constant 0 : i32
    return %c0_i32, %c0_i32_0 : i32, i32
  }
  func.func @transform_3(%arg0: i32) -> (i32, i32) {
    %c0_i32 = arith.constant 0 : i32
    %c0_i32_0 = arith.constant 0 : i32
    return %arg0, %c0_i32 : i32, i32
  }
}

</mosaic_0001>

<bundles_post_ra>
// kernel: tpu_custom_call.1
= control target key start
LH: loop header
LB: loop body
LE: loop exit
PB: predicated region body
PF: predicated region fallthrough
CT: control target
= control target key end

     0   :  { %6 = vsyncpa [#allocation3], 0  ;;  %s286_s0 = inlined_call_operand.hbm [shape: f32[8,128], index: 0, kind: input, shape index: {}]   ;;  %s287_s1 = inlined_call_operand.hbm [shape: f32[8,128], index: 1, kind: output, shape index: {}]  }
   0x1   :  { %7 = vsyncpa [#allocation4], 0  ;;  %s269_s6 = smov 0  }
   0x2 LB: > { %s148_s7 = sadd.s32 4294967295, %s255_s6   ;;  %p149_p0 = scmp.ge.s32.totalorder %s255_s6, 1  ;;  %s255_s6 = sphi %s269_s6, %s13_s6  }
   0x3   : > { %p60_p1 = scmp.lt.s32.totalorder %s255_s6, 3  ;;  %s72_s10 = sshll.u32 %s286_s0, 4  ;;  %s73_s10 = int_to_ptr.hbm [resolvable:$true] %s72_s10 }
   0x4   : > { %p169_p3 = scmp.eq.s32.totalorder %s148_s7, 0  ;;  %s257_s11 = smov [#allocation2]  }
   0x5   : > { %p61_p2 = pnand %p149_p0, %p60_p1  ;;  %s74_s12 = sshll.u32 %s257_s11, 4  ;;  %s75_s12 = int_to_ptr.vmem [resolvable:$true] %s74_s12 }
   0x7   : > { %p165_p4 = pneg %p61_p2  ;;  %87 = sbr.rel (%p61_p2) target bundleno = 19 (0x13), region = 24 }
   0x9   : > { %p166_p5 = pnand %p169_p3, %p165_p4 }
   0xb   : > { %168 = dma.hbm_to_vmem [thread:$0]  (!%p166_p5), %s73_s10, 128, %s75_s12, [#allocation3]  }
   0xc   : > { %246 = dma.done.wait (%p169_p3), [#allocation3], 128  }
   0xd   : > { %248 = vsyncadd (%p169_p3), [#allocation3], 4294967168  ;;  %s258_s13 = smov [#allocation5]   ;;  %s108_s17 = sshll.u32 %s287_s1, 4  ;;  %v98_v0 = vld [vmem:[#allocation2] sm:$0xff]  ;;  %s109_s17 = int_to_ptr.hbm [resolvable:$true] %s108_s17 }
   0xe   : > { %s106_s14 = sshll.u32 %s258_s13, 4  ;;  %p171_p6 = scmp.eq.s32.totalorder %s148_s7, 1  ;;  %99 = vst [vmem:[#allocation5] sm:$0xff] %v98_v0  ;;  %s107_s14 = int_to_ptr.vmem [resolvable:$true] %s106_s14 }
  0x10   : > { %162 = dma.vmem_to_hbm [thread:$0]  (%p171_p6), %s107_s14, 128, %s109_s17, [#allocation4]  }
  0x11   : > { %250 = dma.done.wait (%p171_p6), [#allocation4], 128  }
  0x12   : > { %252 = vsyncadd (%p171_p6), [#allocation4], 4294967168 }
  0x13 PF: > { %s13_s6 = sadd.s32 1, %s255_s6  }
  0x14   : > { %p10_p7 = scmp.ge.s32.totalorder %s13_s6, 4  }
  0x16   :  { %12 = sbr.rel (!%p10_p7) target bundleno = 2 (0x2), region = 53 }
  0x1b   :  { %122 = vsyncpa [#allocation3], 1 }
  0x1c   :  { %124 = vsyncpa [#allocation3 + $0x1], 1 }
  0x1d   :  { %125 = vsyncpa [#allocation4], 1 }
  0x1e   :  { %127 = vsyncpa [#allocation4 + $0x1], 1 }

// kernel: tpu_custom_call.1
= control target key start
LH: loop header
LB: loop body
LE: loop exit
PB: predicated region body
PF: predicated region fallthrough
CT: control target
= control target key end

     0   :  { %8 = vsyncpa [#allocation3], 0  ;;  %s842_s0 = inlined_call_operand.hbm [shape: f32[32,256], index: 0, kind: input, shape index: {}]   ;;  %s843_s1 = inlined_call_operand.hbm [shape: f32[256,768], index: 1, kind: input, shape index: {}]   ;;  %s844_s2 = inlined_call_operand.hbm [shape: f32[1,768], index: 2, kind: input, shape index: {}]   ;;  %s845_s3 = inlined_call_operand.hbm [shape: f32[32,768], index: 3, kind: output, shape index: {}]  }
   0x1   :  { %9 = vsyncpa [#allocation6], 0  ;;  %s28_s14 = sshll.u32 %s843_s1, 4  ;;  %s29_s14 = int_to_ptr.hbm [resolvable:$true] %s28_s14 }
   0x2   :  { %10 = vsyncpa [#allocation4], 0  ;;  %s756_s15 = smov [#allocation5]   ;;  %s15_s19 = sshll.u32 %s842_s0, 4  ;;  %s16_s19 = int_to_ptr.hbm [resolvable:$true] %s15_s19 }
   0x3   :  { %s30_s16 = sshll.u32 %s756_s15, 4  ;;  %s757_s20 = smov 768   ;;  %s31_s16 = int_to_ptr.vmem [resolvable:$true] %s30_s16 }
   0x4   :  { %s758_s21 = smov 48   ;;  %s759_s22 = smov [#allocation2]  }
   0x5   :  { %36 = dma.hbm_to_vmem [thread:$0]  %s29_s14, 24576, %s31_s16, [#allocation6], %s757_s20, %s757_s20, %s758_s21  }
   0x6   :  { %s17_s23 = sshll.u32 %s759_s22, 4  ;;  %s760_s1 = smov 256   ;;  %s18_s23 = int_to_ptr.vmem [resolvable:$true] %s17_s23 }
   0x7   :  { %s761_s24 = smov 16   ;;  %s42_s27 = sshll.u32 %s844_s2, 4  ;;  %s43_s27 = int_to_ptr.hbm [resolvable:$true] %s42_s27 }
   0x8   :  { %23 = dma.hbm_to_vmem [thread:$0]  %s16_s19, 1024, %s18_s23, [#allocation3], %s760_s1, %s760_s1, %s761_s24  }
   0x9   :  { %s762_s28 = smov [#allocation7]  }
   0xa   :  { %s44_s0 = sshll.u32 %s762_s28, 4  ;;  %s45_s0 = int_to_ptr.vmem [resolvable:$true] %s44_s0 }
   0xb   :  { %47 = dma.hbm_to_vmem [thread:$0]  %s43_s27, 96, %s45_s0, [#allocation6]  }
   0xc   :  { %750 = dma.done.wait [#allocation3], 1024  }
   0xd   :  { %751 = vsyncadd [#allocation3], 4294966272 }
   0xe   :  { %752 = dma.done.wait [#allocation6], 24672  }
   0xf   :  { %753 = vsyncadd [#allocation6], 4294942624  ;;  %v156_v0 = vld [vmem:[#allocation5 + $0x2a0] sm:$0xff]  ;;  %v162_v1 = vld [vmem:[#allocation5 + $0x2d0] sm:$0xff]  ;;  %s763_s2 = smov [#allocation8]   ;;  %s632_s5 = sshll.u32 %s845_s3, 4  ;;  %s633_s5 = int_to_ptr.hbm [resolvable:$true] %s632_s5 }
  0x10   :  { %v252_v2 = vld [vmem:[#allocation5 + $0x5a0] sm:$0xff]  ;;  %v306_v3 = vpack.c.bf16 %v162_v1, %v156_v0  ;;  %v258_v4 = vld [vmem:[#allocation5 + $0x5d0] sm:$0xff]  ;;  %v157_v5 = vld [vmem:[#allocation5 + $0x2a8] sm:$0xff]  ;;  %s630_s29 = sshll.u32 %s763_s2, 4  ;;  %s631_s29 = int_to_ptr.vmem [resolvable:$true] %s630_s29 }
  0x11   :  { %v163_v6 = vld [vmem:[#allocation5 + $0x2d8] sm:$0xff]  ;;  %v354_v7 = vpack.c.bf16 %v258_v4, %v252_v2  ;;  %v253_v9 = vld [vmem:[#allocation5 + $0x5a8] sm:$0xff]  ;;  %v144_v11 = vld [vmem:[#allocation5 + $0x240] sm:$0xff] }
  0x12   :  { %v307_v8 = vpack.c.bf16 %v163_v6, %v157_v5  ;;  %v259_v10 = vld [vmem:[#allocation5 + $0x5d8] sm:$0xff]  ;;  %374 = vmatpush.bf16.msra.mxu0 %v306_v3  ;;  %v150_v13 = vld [vmem:[#allocation5 + $0x270] sm:$0xff]  ;;  %v240_v14 = vld [vmem:[#allocation5 + $0x540] sm:$0xff] }
  0x13   :  { %v355_v12 = vpack.c.bf16 %v259_v10, %v253_v9  ;;  %v246_v15 = vld [vmem:[#allocation5 + $0x570] sm:$0xff]  ;;  %393 = vmatpush.bf16.msra.mxu1 %v354_v7  ;;  %v300_v16 = vpack.c.bf16 %v150_v13, %v144_v11  ;;  %v145_v18 = vld [vmem:[#allocation5 + $0x248] sm:$0xff]  ;;  %v151_v19 = vld [vmem:[#allocation5 + $0x278] sm:$0xff] }
  0x14   :  { %412 = vmatpush.bf16.msra.mxu2 %v307_v8  ;;  %v348_v17 = vpack.c.bf16 %v246_v15, %v240_v14  ;;  %v241_v20 = vld [vmem:[#allocation5 + $0x548] sm:$0xff]  ;;  %v301_v21 = vpack.c.bf16 %v151_v19, %v145_v18  ;;  %v247_v22 = vld [vmem:[#allocation5 + $0x578] sm:$0xff]  ;;  %v132_v23 = vld [vmem:[#allocation5 + $0x1e0] sm:$0xff] }
  0x15   :  { %431 = vmatpush.bf16.msra.mxu3 %v355_v12  ;;  %v138_v24 = vld [vmem:[#allocation5 + $0x210] sm:$0xff]  ;;  %v349_v25 = vpack.c.bf16 %v247_v22, %v241_v20  ;;  %v228_v26 = vld [vmem:[#allocation5 + $0x4e0] sm:$0xff]  ;;  %v133_v28 = vld [vmem:[#allocation5 + $0x1e8] sm:$0xff] }
  0x16   :  { %v234_v27 = vld [vmem:[#allocation5 + $0x510] sm:$0xff]  ;;  %375 = vmatpush.bf16.msra.mxu0 %v300_v16  ;;  %v294_v29 = vpack.c.bf16 %v138_v24, %v132_v23  ;;  %v139_v30 = vld [vmem:[#allocation5 + $0x218] sm:$0xff]  ;;  %v229_v31 = vld [vmem:[#allocation5 + $0x4e8] sm:$0xff] }
  0x17   :  { %v235_v32 = vld [vmem:[#allocation5 + $0x518] sm:$0xff]  ;;  %394 = vmatpush.bf16.msra.mxu1 %v348_v17  ;;  %v342_v33 = vpack.c.bf16 %v234_v27, %v228_v26  ;;  %v295_v34 = vpack.c.bf16 %v139_v30, %v133_v28  ;;  %v120_v35 = vld [vmem:[#allocation5 + $0x180] sm:$0xff]  ;;  %v126_v36 = vld [vmem:[#allocation5 + $0x1b0] sm:$0xff] }
  0x18   :  { %413 = vmatpush.bf16.msra.mxu2 %v301_v21  ;;  %v216_v37 = vld [vmem:[#allocation5 + $0x480] sm:$0xff]  ;;  %v343_v38 = vpack.c.bf16 %v235_v32, %v229_v31  ;;  %v222_v39 = vld [vmem:[#allocation5 + $0x4b0] sm:$0xff]  ;;  %v121_v40 = vld [vmem:[#allocation5 + $0x188] sm:$0xff]  ;;  %v288_v44 = vpack.c.bf16 %v126_v36, %v120_v35 }
  0x19   :  { %432 = vmatpush.bf16.msra.mxu3 %v349_v25  ;;  %v127_v41 = vld [vmem:[#allocation5 + $0x1b8] sm:$0xff]  ;;  %v217_v42 = vld [vmem:[#allocation5 + $0x488] sm:$0xff]  ;;  %v336_v45 = vpack.c.bf16 %v222_v39, %v216_v37  ;;  %v108_v47 = vld [vmem:[#allocation5 + $0x120] sm:$0xff] }
  0x1a   :  { %v223_v43 = vld [vmem:[#allocation5 + $0x4b8] sm:$0xff]  ;;  %376 = vmatpush.bf16.msra.mxu0 %v294_v29  ;;  %v289_v46 = vpack.c.bf16 %v127_v41, %v121_v40  ;;  %v114_v48 = vld [vmem:[#allocation5 + $0x150] sm:$0xff]  ;;  %v204_v49 = vld [vmem:[#allocation5 + $0x420] sm:$0xff] }
  0x1b   :  { %395 = vmatpush.bf16.msra.mxu1 %v342_v33  ;;  %v337_v50 = vpack.c.bf16 %v223_v43, %v217_v42  ;;  %v210_v51 = vld [vmem:[#allocation5 + $0x450] sm:$0xff]  ;;  %v109_v52 = vld [vmem:[#allocation5 + $0x128] sm:$0xff]  ;;  %v115_v53 = vld [vmem:[#allocation5 + $0x158] sm:$0xff]  ;;  %v282_v56 = vpack.c.bf16 %v114_v48, %v108_v47 }
  0x1c   :  { %414 = vmatpush.bf16.msra.mxu2 %v295_v34  ;;  %v205_v54 = vld [vmem:[#allocation5 + $0x428] sm:$0xff]  ;;  %v211_v55 = vld [vmem:[#allocation5 + $0x458] sm:$0xff]  ;;  %v330_v57 = vpack.c.bf16 %v210_v51, %v204_v49  ;;  %v283_v58 = vpack.c.bf16 %v115_v53, %v109_v52  ;;  %v96_v59 = vld [vmem:[#allocation5 + $0xc0] sm:$0xff] }
  0x1d   :  { %433 = vmatpush.bf16.msra.mxu3 %v343_v38  ;;  %v102_v60 = vld [vmem:[#allocation5 + $0xf0] sm:$0xff]  ;;  %v192_v61 = vld [vmem:[#allocation5 + $0x3c0] sm:$0xff]  ;;  %v331_v62 = vpack.c.bf16 %v211_v55, %v205_v54  ;;  %v97_v0 = vld [vmem:[#allocation5 + $0xc8] sm:$0xff] }
  0x1e   :  { %377 = vmatpush.bf16.msra.mxu0 %v288_v44  ;;  %v198_v63 = vld [vmem:[#allocation5 + $0x3f0] sm:$0xff]  ;;  %v103_v1 = vld [vmem:[#allocation5 + $0xf8] sm:$0xff]  ;;  %v193_v2 = vld [vmem:[#allocation5 + $0x3c8] sm:$0xff]  ;;  %v276_v4 = vpack.c.bf16 %v102_v60, %v96_v59 }
  0x1f   :  { %396 = vmatpush.bf16.msra.mxu1 %v336_v45  ;;  %v199_v3 = vld [vmem:[#allocation5 + $0x3f8] sm:$0xff]  ;;  %v324_v5 = vpack.c.bf16 %v198_v63, %v192_v61  ;;  %v277_v6 = vpack.c.bf16 %v103_v1, %v97_v0  ;;  %v84_v7 = vld [vmem:[#allocation5 + $0x60] sm:$0xff]  ;;  %v90_v8 = vld [vmem:[#allocation5 + $0x90] sm:$0xff] }
  0x20   :  { %415 = vmatpush.bf16.msra.mxu2 %v289_v46  ;;  %v180_v9 = vld [vmem:[#allocation5 + $0x360] sm:$0xff]  ;;  %v325_v10 = vpack.c.bf16 %v199_v3, %v193_v2  ;;  %v186_v11 = vld [vmem:[#allocation5 + $0x390] sm:$0xff]  ;;  %v85_v12 = vld [vmem:[#allocation5 + $0x68] sm:$0xff]  ;;  %v270_v16 = vpack.c.bf16 %v90_v8, %v84_v7 }
  0x21   :  { %434 = vmatpush.bf16.msra.mxu3 %v337_v50  ;;  %v91_v13 = vld [vmem:[#allocation5 + $0x98] sm:$0xff]  ;;  %v181_v14 = vld [vmem:[#allocation5 + $0x368] sm:$0xff]  ;;  %v72_v17 = vld [vmem:[#allocation5] sm:$0xff]  ;;  %v318_v19 = vpack.c.bf16 %v186_v11, %v180_v9 }
  0x22   :  { %378 = vmatpush.bf16.msra.mxu0 %v282_v56  ;;  %v187_v15 = vld [vmem:[#allocation5 + $0x398] sm:$0xff]  ;;  %v78_v18 = vld [vmem:[#allocation5 + $0x30] sm:$0xff]  ;;  %v271_v20 = vpack.c.bf16 %v91_v13, %v85_v12  ;;  %v168_v21 = vld [vmem:[#allocation5 + $0x300] sm:$0xff] }
  0x23   :  { %397 = vmatpush.bf16.msra.mxu1 %v330_v57  ;;  %v174_v22 = vld [vmem:[#allocation5 + $0x330] sm:$0xff]  ;;  %v73_v23 = vld [vmem:[#allocation5 + $0x8] sm:$0xff]  ;;  %v319_v24 = vpack.c.bf16 %v187_v15, %v181_v14  ;;  %v79_v25 = vld [vmem:[#allocation5 + $0x38] sm:$0xff]  ;;  %v264_v31 = vpack.c.bf16 %v78_v18, %v72_v17 }
  0x24   :  { %416 = vmatpush.bf16.msra.mxu2 %v283_v58  ;;  %v169_v26 = vld [vmem:[#allocation5 + $0x308] sm:$0xff]  ;;  %v175_v27 = vld [vmem:[#allocation5 + $0x338] sm:$0xff]  ;;  %v60_v28 = vld [vmem:[#allocation2] sm:$0xff]  ;;  %v312_v35 = vpack.c.bf16 %v174_v22, %v168_v21  ;;  %v265_v36 = vpack.c.bf16 %v79_v25, %v73_v23 }
  0x25   :  { %435 = vmatpush.bf16.msra.mxu3 %v331_v62  ;;  %v159_v29 = vld [vmem:[#allocation5 + $0x2b8] sm:$0xff]  ;;  %v165_v30 = vld [vmem:[#allocation5 + $0x2e8] sm:$0xff]  ;;  %v62_v32 = vld [vmem:[#allocation2 + $0x10] sm:$0xff]  ;;  %v313_v39 = vpack.c.bf16 %v175_v27, %v169_v26 }
  0x26   :  { %379 = vmatpush.bf16.msra.mxu0 %v276_v4  ;;  %v254_v33 = vld [vmem:[#allocation5 + $0x5b0] sm:$0xff]  ;;  %v260_v34 = vld [vmem:[#allocation5 + $0x5e0] sm:$0xff]  ;;  %v61_v37 = vld [vmem:[#allocation2 + $0x8] sm:$0xff]  ;;  %v309_v40 = vpack.c.bf16 %v165_v30, %v159_v29  ;;  %v796_v44 = vpack.c.bf16 %v62_v32, %v60_v28 }
  0x27   :  { %398 = vmatpush.bf16.msra.mxu1 %v324_v5  ;;  %v63_v38 = vld [vmem:[#allocation2 + $0x18] sm:$0xff]  ;;  %v158_v41 = vld [vmem:[#allocation5 + $0x2b0] sm:$0xff]  ;;  %v164_v42 = vld [vmem:[#allocation5 + $0x2e0] sm:$0xff]  ;;  %v356_v45 = vpack.c.bf16 %v260_v34, %v254_v33 }
  0x28   :  { %417 = vmatpush.bf16.msra.mxu2 %v277_v6  ;;  %v255_v43 = vld [vmem:[#allocation5 + $0x5b8] sm:$0xff]  ;;  %v261_v46 = vld [vmem:[#allocation5 + $0x5e8] sm:$0xff]  ;;  %v798_v49 = vpack.c.bf16 %v63_v38, %v61_v37  ;;  %v242_v50 = vld [vmem:[#allocation5 + $0x550] sm:$0xff]  ;;  %v308_v52 = vpack.c.bf16 %v164_v42, %v158_v41 }
  0x29   :  { %436 = vmatpush.bf16.msra.mxu3 %v325_v10  ;;  %v147_v47 = vld [vmem:[#allocation5 + $0x258] sm:$0xff]  ;;  %v153_v48 = vld [vmem:[#allocation5 + $0x288] sm:$0xff]  ;;  %v248_v51 = vld [vmem:[#allocation5 + $0x580] sm:$0xff]  ;;  %v357_v53 = vpack.c.bf16 %v261_v46, %v255_v43 }
  0x2a   :  { %380 = vmatpush.bf16.msra.mxu0 %v270_v16  ;;  %v303_v54 = vpack.c.bf16 %v153_v48, %v147_v47  ;;  %v146_v55 = vld [vmem:[#allocation5 + $0x250] sm:$0xff]  ;;  %v152_v56 = vld [vmem:[#allocation5 + $0x280] sm:$0xff]  ;;  %v243_v57 = vld [vmem:[#allocation5 + $0x558] sm:$0xff]  ;;  %v350_v58 = vpack.c.bf16 %v248_v51, %v242_v50 }
  0x2b   :  { %399 = vmatpush.bf16.msra.mxu1 %v318_v19  ;;  %v249_v59 = vld [vmem:[#allocation5 + $0x588] sm:$0xff]  ;;  %v135_v60 = vld [vmem:[#allocation5 + $0x1f8] sm:$0xff]  ;;  %v230_v62 = vld [vmem:[#allocation5 + $0x4f0] sm:$0xff]  ;;  %v302_v0 = vpack.c.bf16 %v152_v56, %v146_v55 }
  0x2c   :  { %418 = vmatpush.bf16.msra.mxu2 %v271_v20  ;;  %v141_v61 = vld [vmem:[#allocation5 + $0x228] sm:$0xff]  ;;  %v236_v63 = vld [vmem:[#allocation5 + $0x520] sm:$0xff]  ;;  %v351_v1 = vpack.c.bf16 %v249_v59, %v243_v57  ;;  %v134_v3 = vld [vmem:[#allocation5 + $0x1f0] sm:$0xff] }
  0x2d   :  { %437 = vmatpush.bf16.msra.mxu3 %v319_v24  ;;  %v297_v2 = vpack.c.bf16 %v141_v61, %v135_v60  ;;  %v140_v4 = vld [vmem:[#allocation5 + $0x220] sm:$0xff]  ;;  %v231_v5 = vld [vmem:[#allocation5 + $0x4f8] sm:$0xff]  ;;  %v344_v6 = vpack.c.bf16 %v236_v63, %v230_v62  ;;  %v237_v7 = vld [vmem:[#allocation5 + $0x528] sm:$0xff] }
  0x2e   :  { %381 = vmatpush.bf16.msra.mxu0 %v264_v31  ;;  %v123_v8 = vld [vmem:[#allocation5 + $0x198] sm:$0xff]  ;;  %v129_v9 = vld [vmem:[#allocation5 + $0x1c8] sm:$0xff]  ;;  %v218_v10 = vld [vmem:[#allocation5 + $0x490] sm:$0xff]  ;;  %v296_v12 = vpack.c.bf16 %v140_v4, %v134_v3  ;;  %v345_v14 = vpack.c.bf16 %v237_v7, %v231_v5 }
  0x2f   :  { %400 = vmatpush.bf16.msra.mxu1 %v312_v35  ;;  %v224_v11 = vld [vmem:[#allocation5 + $0x4c0] sm:$0xff]  ;;  %v122_v13 = vld [vmem:[#allocation5 + $0x190] sm:$0xff]  ;;  %v291_v15 = vpack.c.bf16 %v129_v9, %v123_v8  ;;  %v219_v17 = vld [vmem:[#allocation5 + $0x498] sm:$0xff] }
  0x30   :  { %419 = vmatpush.bf16.msra.mxu2 %v265_v36  ;;  %v128_v16 = vld [vmem:[#allocation5 + $0x1c0] sm:$0xff]  ;;  %v225_v18 = vld [vmem:[#allocation5 + $0x4c8] sm:$0xff]  ;;  %v338_v19 = vpack.c.bf16 %v224_v11, %v218_v10  ;;  %v111_v21 = vld [vmem:[#allocation5 + $0x138] sm:$0xff] }
  0x31   :  { %438 = vmatpush.bf16.msra.mxu3 %v313_v39  ;;  %382 = vmatmul.bf16.vlgmr.msra.gmra.mxu0 %v796_v44  ;;  %v64_v20 = vld [vmem:[#allocation2 + $0x20] sm:$0xff]  ;;  %v117_v22 = vld [vmem:[#allocation5 + $0x168] sm:$0xff]  ;;  %v66_v23 = vld [vmem:[#allocation2 + $0x30] sm:$0xff]  ;;  %v290_v26 = vpack.c.bf16 %v128_v16, %v122_v13  ;;  %v339_v29 = vpack.c.bf16 %v225_v18, %v219_v17 }
  0x32   :  { %401 = vmatmul.bf16.vlgmr.msra.gmra.mxu1 %v798_v49  ;;  %450 = vmatpush.bf16.msrb.mxu0 %v308_v52  ;;  %v206_v24 = vld [vmem:[#allocation5 + $0x430] sm:$0xff]  ;;  %v212_v25 = vld [vmem:[#allocation5 + $0x460] sm:$0xff]  ;;  %v65_v27 = vld [vmem:[#allocation2 + $0x28] sm:$0xff]  ;;  %v285_v30 = vpack.c.bf16 %v117_v22, %v111_v21  ;;  %v804_v34 = vpack.c.bf16 %v66_v23, %v64_v20 }
  0x33   :  { %469 = vmatpush.bf16.msrb.mxu1 %v356_v45  ;;  %420 = vmatmul.bf16.vlgmr.msra.gmra.mxu2 %v796_v44  ;;  %v67_v28 = vld [vmem:[#allocation2 + $0x38] sm:$0xff]  ;;  %v110_v31 = vld [vmem:[#allocation5 + $0x130] sm:$0xff]  ;;  %v116_v32 = vld [vmem:[#allocation5 + $0x160] sm:$0xff]  ;;  %v332_v35 = vpack.c.bf16 %v212_v25, %v206_v24 }
  0x34   :  { %488 = vmatpush.bf16.msrb.mxu2 %v309_v40  ;;  %439 = vmatmul.bf16.vlgmr.msra.gmra.mxu3 %v798_v49  ;;  %v207_v33 = vld [vmem:[#allocation5 + $0x438] sm:$0xff]  ;;  %v213_v36 = vld [vmem:[#allocation5 + $0x468] sm:$0xff]  ;;  %v806_v39 = vpack.c.bf16 %v67_v28, %v65_v27  ;;  %v194_v40 = vld [vmem:[#allocation5 + $0x3d0] sm:$0xff]  ;;  %v284_v42 = vpack.c.bf16 %v116_v32, %v110_v31 }
  0x35   :  { %507 = vmatpush.bf16.msrb.mxu3 %v357_v53  ;;  %v99_v37 = vld [vmem:[#allocation5 + $0xd8] sm:$0xff]  ;;  %v105_v38 = vld [vmem:[#allocation5 + $0x108] sm:$0xff]  ;;  %v200_v41 = vld [vmem:[#allocation5 + $0x400] sm:$0xff]  ;;  %v333_v43 = vpack.c.bf16 %v213_v36, %v207_v33 }
  0x36   :  { %451 = vmatpush.bf16.msrb.mxu0 %v302_v0  ;;  %v279_v45 = vpack.c.bf16 %v105_v38, %v99_v37  ;;  %v98_v46 = vld [vmem:[#allocation5 + $0xd0] sm:$0xff]  ;;  %v104_v47 = vld [vmem:[#allocation5 + $0x100] sm:$0xff]  ;;  %v195_v48 = vld [vmem:[#allocation5 + $0x3d8] sm:$0xff]  ;;  %v326_v50 = vpack.c.bf16 %v200_v41, %v194_v40 }
  0x37   :  { %470 = vmatpush.bf16.msrb.mxu1 %v350_v58  ;;  %v201_v51 = vld [vmem:[#allocation5 + $0x408] sm:$0xff]  ;;  %v87_v52 = vld [vmem:[#allocation5 + $0x78] sm:$0xff]  ;;  %v188_v55 = vld [vmem:[#allocation5 + $0x3a0] sm:$0xff]  ;;  %v278_v56 = vpack.c.bf16 %v104_v47, %v98_v46 }
  0x38   :  { %489 = vmatpush.bf16.msrb.mxu2 %v303_v54  ;;  %v93_v53 = vld [vmem:[#allocation5 + $0xa8] sm:$0xff]  ;;  %v182_v54 = vld [vmem:[#allocation5 + $0x370] sm:$0xff]  ;;  %v327_v58 = vpack.c.bf16 %v201_v51, %v195_v48  ;;  %v92_v60 = vld [vmem:[#allocation5 + $0xa0] sm:$0xff] }
  0x39   :  { %508 = vmatpush.bf16.msrb.mxu3 %v351_v1  ;;  %v86_v57 = vld [vmem:[#allocation5 + $0x70] sm:$0xff]  ;;  %v273_v59 = vpack.c.bf16 %v93_v53, %v87_v52  ;;  %v183_v61 = vld [vmem:[#allocation5 + $0x378] sm:$0xff]  ;;  %v189_v62 = vld [vmem:[#allocation5 + $0x3a8] sm:$0xff]  ;;  %v320_v63 = vpack.c.bf16 %v188_v55, %v182_v54 }
  0x3a   :  { %452 = vmatpush.bf16.msrb.mxu0 %v296_v12  ;;  %v75_v0 = vld [vmem:[#allocation5 + $0x18] sm:$0xff]  ;;  %v81_v1 = vld [vmem:[#allocation5 + $0x48] sm:$0xff]  ;;  %v176_v3 = vld [vmem:[#allocation5 + $0x340] sm:$0xff]  ;;  %v321_v10 = vpack.c.bf16 %v189_v62, %v183_v61 }
  0x3b   :  { %471 = vmatpush.bf16.msrb.mxu1 %v344_v6  ;;  %v161_v4 = vld [vmem:[#allocation5 + $0x2c8] sm:$0xff]  ;;  %v167_v5 = vld [vmem:[#allocation5 + $0x2f8] sm:$0xff]  ;;  %v272_v6 = vpack.c.bf16 %v92_v60, %v86_v57  ;;  %v74_v7 = vld [vmem:[#allocation5 + $0x10] sm:$0xff]  ;;  %v267_v11 = vpack.c.bf16 %v81_v1, %v75_v0 }
  0x3c   :  { %490 = vmatpush.bf16.msrb.mxu2 %v297_v2  ;;  %v170_v2 = vld [vmem:[#allocation5 + $0x310] sm:$0xff]  ;;  %v256_v8 = vld [vmem:[#allocation5 + $0x5c0] sm:$0xff]  ;;  %v171_v13 = vld [vmem:[#allocation5 + $0x318] sm:$0xff]  ;;  %v311_v16 = vpack.c.bf16 %v167_v5, %v161_v4 }
  0x3d   :  { %509 = vmatpush.bf16.msrb.mxu3 %v345_v14  ;;  %v262_v9 = vld [vmem:[#allocation5 + $0x5f0] sm:$0xff]  ;;  %v80_v12 = vld [vmem:[#allocation5 + $0x40] sm:$0xff]  ;;  %v177_v14 = vld [vmem:[#allocation5 + $0x348] sm:$0xff] }
  0x3e   :  { %453 = vmatpush.bf16.msrb.mxu0 %v290_v26  ;;  %v160_v17 = vld [vmem:[#allocation5 + $0x2c0] sm:$0xff]  ;;  %v166_v18 = vld [vmem:[#allocation5 + $0x2f0] sm:$0xff]  ;;  %v358_v20 = vpack.c.bf16 %v262_v9, %v256_v8  ;;  %v263_v21 = vld [vmem:[#allocation5 + $0x5f8] sm:$0xff]  ;;  %v266_v24 = vpack.c.bf16 %v80_v12, %v74_v7  ;;  %v315_v25 = vpack.c.bf16 %v177_v14, %v171_v13 }
  0x3f   :  { %472 = vmatpush.bf16.msrb.mxu1 %v338_v19  ;;  %v257_v19 = vld [vmem:[#allocation5 + $0x5c8] sm:$0xff]  ;;  %v155_v23 = vld [vmem:[#allocation5 + $0x298] sm:$0xff]  ;;  %v310_v26 = vpack.c.bf16 %v166_v18, %v160_v17  ;;  %v148_v27 = vld [vmem:[#allocation5 + $0x260] sm:$0xff] }
  0x40   :  { %491 = vmatpush.bf16.msrb.mxu2 %v291_v15  ;;  %v314_v15 = vpack.c.bf16 %v176_v3, %v170_v2  ;;  %v149_v22 = vld [vmem:[#allocation5 + $0x268] sm:$0xff]  ;;  %v154_v28 = vld [vmem:[#allocation5 + $0x290] sm:$0xff]  ;;  %v244_v31 = vld [vmem:[#allocation5 + $0x560] sm:$0xff] }
  0x41   :  { %510 = vmatpush.bf16.msrb.mxu3 %v339_v29  ;;  %387 = vmatmul.bf16.gmra.mxu0 %v804_v34  ;;  %v359_v29 = vpack.c.bf16 %v263_v21, %v257_v19  ;;  %v250_v32 = vld [vmem:[#allocation5 + $0x590] sm:$0xff]  ;;  %v245_v33 = vld [vmem:[#allocation5 + $0x568] sm:$0xff]  ;;  %v143_v37 = vld [vmem:[#allocation5 + $0x238] sm:$0xff]  ;;  %v304_v38 = vpack.c.bf16 %v154_v28, %v148_v27 }
  0x42   :  { %406 = vmatmul.bf16.gmra.mxu1 %v806_v39  ;;  %454 = vmatpush.bf16.msrb.mxu0 %v284_v42  ;;  %v137_v36 = vld [vmem:[#allocation5 + $0x208] sm:$0xff]  ;;  %v352_v40 = vpack.c.bf16 %v250_v32, %v244_v31  ;;  %v136_v41 = vld [vmem:[#allocation5 + $0x200] sm:$0xff]  ;;  %v142_v42 = vld [vmem:[#allocation5 + $0x230] sm:$0xff] }
  0x43   :  { %473 = vmatpush.bf16.msrb.mxu1 %v332_v35  ;;  %425 = vmatmul.bf16.gmra.mxu2 %v804_v34  ;;  %v251_v35 = vld [vmem:[#allocation5 + $0x598] sm:$0xff]  ;;  %v232_v46 = vld [vmem:[#allocation5 + $0x500] sm:$0xff]  ;;  %v238_v47 = vld [vmem:[#allocation5 + $0x530] sm:$0xff]  ;;  %v298_v53 = vpack.c.bf16 %v142_v42, %v136_v41 }
  0x44   :  { %492 = vmatpush.bf16.msrb.mxu2 %v285_v30  ;;  %444 = vmatmul.bf16.gmra.mxu3 %v806_v39  ;;  %v305_v30 = vpack.c.bf16 %v155_v23, %v149_v22  ;;  %v233_v48 = vld [vmem:[#allocation5 + $0x508] sm:$0xff]  ;;  %v131_v52 = vld [vmem:[#allocation5 + $0x1d8] sm:$0xff]  ;;  %v346_v54 = vpack.c.bf16 %v238_v47, %v232_v46  ;;  %v124_v55 = vld [vmem:[#allocation5 + $0x1a0] sm:$0xff] }
  0x45   :  { %511 = vmatpush.bf16.msrb.mxu3 %v333_v43  ;;  %v353_v43 = vpack.c.bf16 %v251_v35, %v245_v33  ;;  %v125_v51 = vld [vmem:[#allocation5 + $0x1a8] sm:$0xff]  ;;  %v226_v60 = vld [vmem:[#allocation5 + $0x4d0] sm:$0xff]  ;;  %v227_v62 = vld [vmem:[#allocation5 + $0x4d8] sm:$0xff] }
  0x46   :  { %455 = vmatpush.bf16.msrb.mxu0 %v278_v56  ;;  %v130_v56 = vld [vmem:[#allocation5 + $0x1d0] sm:$0xff]  ;;  %v221_v61 = vld [vmem:[#allocation5 + $0x4a8] sm:$0xff]  ;;  %v119_v0 = vld [vmem:[#allocation5 + $0x178] sm:$0xff] }
  0x47   :  { %474 = vmatpush.bf16.msrb.mxu1 %v326_v50  ;;  %v239_v50 = vld [vmem:[#allocation5 + $0x538] sm:$0xff]  ;;  %v292_v1 = vpack.c.bf16 %v130_v56, %v124_v55  ;;  %v112_v3 = vld [vmem:[#allocation5 + $0x140] sm:$0xff]  ;;  %v118_v4 = vld [vmem:[#allocation5 + $0x170] sm:$0xff]  ;;  %v341_v5 = vpack.c.bf16 %v227_v62, %v221_v61 }
  0x48   :  { %493 = vmatpush.bf16.msrb.mxu2 %v279_v45  ;;  %v299_v45 = vpack.c.bf16 %v143_v37, %v137_v36  ;;  %v347_v57 = vpack.c.bf16 %v239_v50, %v233_v48  ;;  %v208_v7 = vld [vmem:[#allocation5 + $0x440] sm:$0xff]  ;;  %v214_v8 = vld [vmem:[#allocation5 + $0x470] sm:$0xff]  ;;  %v209_v9 = vld [vmem:[#allocation5 + $0x448] sm:$0xff]  ;;  %v286_v13 = vpack.c.bf16 %v118_v4, %v112_v3 }
  0x49   :  { %512 = vmatpush.bf16.msrb.mxu3 %v327_v58  ;;  %v293_v58 = vpack.c.bf16 %v131_v52, %v125_v51  ;;  %v107_v12 = vld [vmem:[#allocation5 + $0x118] sm:$0xff]  ;;  %v334_v14 = vpack.c.bf16 %v214_v8, %v208_v7  ;;  %v196_v19 = vld [vmem:[#allocation5 + $0x3e0] sm:$0xff]  ;;  %v197_v21 = vld [vmem:[#allocation5 + $0x3e8] sm:$0xff] }
  0x4a   :  { %456 = vmatpush.bf16.msrb.mxu0 %v272_v6  ;;  %v203_v22 = vld [vmem:[#allocation5 + $0x418] sm:$0xff]  ;;  %v89_v23 = vld [vmem:[#allocation5 + $0x88] sm:$0xff]  ;;  %v88_v27 = vld [vmem:[#allocation5 + $0x80] sm:$0xff] }
  0x4b   :  { %475 = vmatpush.bf16.msrb.mxu1 %v320_v63  ;;  %v113_v63 = vld [vmem:[#allocation5 + $0x148] sm:$0xff]  ;;  %v94_v28 = vld [vmem:[#allocation5 + $0xb0] sm:$0xff]  ;;  %v184_v31 = vld [vmem:[#allocation5 + $0x380] sm:$0xff] }
  0x4c   :  { %494 = vmatpush.bf16.msrb.mxu2 %v273_v59  ;;  %v220_v59 = vld [vmem:[#allocation5 + $0x4a0] sm:$0xff]  ;;  %v287_v6 = vpack.c.bf16 %v119_v0, %v113_v63  ;;  %v190_v32 = vld [vmem:[#allocation5 + $0x3b0] sm:$0xff]  ;;  %v185_v33 = vld [vmem:[#allocation5 + $0x388] sm:$0xff] }
  0x4d   :  { %513 = vmatpush.bf16.msrb.mxu3 %v321_v10  ;;  %v340_v2 = vpack.c.bf16 %v226_v60, %v220_v59  ;;  %v215_v10 = vld [vmem:[#allocation5 + $0x478] sm:$0xff]  ;;  %v77_v36 = vld [vmem:[#allocation5 + $0x28] sm:$0xff]  ;;  %v76_v41 = vld [vmem:[#allocation5 + $0x20] sm:$0xff] }
  0x4e   :  { %457 = vmatpush.bf16.msrb.mxu0 %v266_v24  ;;  %v335_v17 = vpack.c.bf16 %v215_v10, %v209_v9  ;;  %v95_v24 = vld [vmem:[#allocation5 + $0xb8] sm:$0xff]  ;;  %v172_v46 = vld [vmem:[#allocation5 + $0x320] sm:$0xff]  ;;  %v178_v47 = vld [vmem:[#allocation5 + $0x350] sm:$0xff] }
  0x4f   :  { %476 = vmatpush.bf16.msrb.mxu1 %v314_v15  ;;  %v100_v15 = vld [vmem:[#allocation5 + $0xe0] sm:$0xff]  ;;  %v191_v35 = vld [vmem:[#allocation5 + $0x3b8] sm:$0xff]  ;;  %v173_v48 = vld [vmem:[#allocation5 + $0x328] sm:$0xff]  ;;  %v316_v52 = vpack.c.bf16 %v178_v47, %v172_v46 }
  0x50   :  { %495 = vmatpush.bf16.msrb.mxu2 %v267_v11  ;;  %v101_v11 = vld [vmem:[#allocation5 + $0xe8] sm:$0xff]  ;;  %v83_v37 = vld [vmem:[#allocation5 + $0x58] sm:$0xff]  ;;  %v323_v42 = vpack.c.bf16 %v191_v35, %v185_v33 }
  0x51   :  { %514 = vmatpush.bf16.msrb.mxu3 %v315_v25  ;;  %458 = vmatmul.bf16.vlgmr.msrb.gmra.mxu0 %v796_v44  ;;  %v281_v18 = vpack.c.bf16 %v107_v12, %v101_v11  ;;  %v179_v50 = vld [vmem:[#allocation5 + $0x358] sm:$0xff] }
  0x52   :  { %526 = vmatpush.bf16.msra.mxu0 %v310_v26  ;;  %477 = vmatmul.bf16.vlgmr.msrb.gmra.mxu1 %v798_v49 }
  0x53   :  { %545 = vmatpush.bf16.msra.mxu1 %v358_v20  ;;  %496 = vmatmul.bf16.vlgmr.msrb.gmra.mxu2 %v796_v44  ;;  %v202_v20 = vld [vmem:[#allocation5 + $0x410] sm:$0xff] }
  0x54   :  { %564 = vmatpush.bf16.msra.mxu2 %v311_v16  ;;  %515 = vmatmul.bf16.vlgmr.msrb.gmra.mxu3 %v798_v49  ;;  %v106_v16 = vld [vmem:[#allocation5 + $0x110] sm:$0xff]  ;;  %v328_v26 = vpack.c.bf16 %v202_v20, %v196_v19 }
  0x55   :  { %583 = vmatpush.bf16.msra.mxu3 %v359_v29  ;;  %v280_v25 = vpack.c.bf16 %v106_v16, %v100_v15  ;;  %v329_v29 = vpack.c.bf16 %v203_v22, %v197_v21 }
  0x56   :  { %527 = vmatpush.bf16.msra.mxu0 %v304_v38  ;;  %v274_v38 = vpack.c.bf16 %v94_v28, %v88_v27 }
  0x57   :  { %546 = vmatpush.bf16.msra.mxu1 %v352_v40  ;;  %v322_v40 = vpack.c.bf16 %v190_v32, %v184_v31 }
  0x58   :  { %565 = vmatpush.bf16.msra.mxu2 %v305_v30  ;;  %v275_v30 = vpack.c.bf16 %v95_v24, %v89_v23 }
  0x59   :  { %584 = vmatpush.bf16.msra.mxu3 %v353_v43  ;;  %v269_v43 = vpack.c.bf16 %v83_v37, %v77_v36 }
  0x5a   :  { %528 = vmatpush.bf16.msra.mxu0 %v298_v53  ;;  %v317_v53 = vpack.c.bf16 %v179_v50, %v173_v48 }
  0x5b   :  { %547 = vmatpush.bf16.msra.mxu1 %v346_v54  ;;  %v828_v54 = vld [vmem:[#allocation7] sm:$0x3f] }
  0x5c   :  { %566 = vmatpush.bf16.msra.mxu2 %v299_v45  ;;  %v82_v45 = vld [vmem:[#allocation5 + $0x50] sm:$0xff]  ;;  %v362_v55 = vperm.slane %v828_v54, 0 }
  0x5d   :  { %585 = vmatpush.bf16.msra.mxu3 %v347_v57  ;;  %v268_v51 = vpack.c.bf16 %v82_v45, %v76_v41 }
  0x5e   :  { %529 = vmatpush.bf16.msra.mxu0 %v292_v1 }
  0x5f   :  { %548 = vmatpush.bf16.msra.mxu1 %v340_v2 }
  0x60   :  { %567 = vmatpush.bf16.msra.mxu2 %v293_v58 }
  0x61   :  { %586 = vmatpush.bf16.msra.mxu3 %v341_v5  ;;  %463 = vmatmul.bf16.gmra.mxu0 %v804_v34 }
  0x62   :  { %530 = vmatpush.bf16.msra.mxu0 %v286_v13  ;;  %482 = vmatmul.bf16.gmra.mxu1 %v806_v39 }
  0x63   :  { %549 = vmatpush.bf16.msra.mxu1 %v334_v14  ;;  %501 = vmatmul.bf16.gmra.mxu2 %v804_v34 }
  0x64   :  { %568 = vmatpush.bf16.msra.mxu2 %v287_v6  ;;  %520 = vmatmul.bf16.gmra.mxu3 %v806_v39 }
  0x65   :  { %587 = vmatpush.bf16.msra.mxu3 %v335_v17  ;;  %v364_v17 = vperm.slane %v828_v54, 2 }
  0x66   :  { %531 = vmatpush.bf16.msra.mxu0 %v280_v25 }
  0x67   :  { %550 = vmatpush.bf16.msra.mxu1 %v328_v26  ;;  %v365_v26 = vperm.slane %v828_v54, 3 }
  0x68   :  { %569 = vmatpush.bf16.msra.mxu2 %v281_v18 }
  0x69   :  { %588 = vmatpush.bf16.msra.mxu3 %v329_v29 }
  0x6a   :  { %532 = vmatpush.bf16.msra.mxu0 %v274_v38 }
  0x6b   :  { %551 = vmatpush.bf16.msra.mxu1 %v322_v40 }
  0x6c   :  { %570 = vmatpush.bf16.msra.mxu2 %v275_v30 }
  0x6d   :  { %589 = vmatpush.bf16.msra.mxu3 %v323_v42 }
  0x6e   :  { %533 = vmatpush.bf16.msra.mxu0 %v268_v51 }
  0x6f   :  { %552 = vmatpush.bf16.msra.mxu1 %v316_v52 }
  0x70   :  { %571 = vmatpush.bf16.msra.mxu2 %v269_v43 }
  0x71   :  { %590 = vmatpush.bf16.msra.mxu3 %v317_v53  ;;  %534 = vmatmul.bf16.vlgmr.msra.gmra.mxu0 %v796_v44 }
  0x72   :  { %553 = vmatmul.bf16.vlgmr.msra.gmra.mxu1 %v798_v49 }
  0x73   :  { %572 = vmatmul.bf16.vlgmr.msra.gmra.mxu2 %v796_v44  ;;  %v363_v44 = vperm.slane %v828_v54, 1 }
  0x74   :  { %591 = vmatmul.bf16.vlgmr.msra.gmra.mxu3 %v798_v49 }
  0x81   :  { %539 = vmatmul.bf16.gmra.mxu0 %v804_v34 }
  0x82   :  { %558 = vmatmul.bf16.gmra.mxu1 %v806_v39 }
  0x83   :  { %577 = vmatmul.bf16.gmra.mxu2 %v804_v34 }
  0x84   :  { %596 = vmatmul.bf16.gmra.mxu3 %v806_v39 }
  0xae   :  { %v383_v56 = vpop.f32.mrf.mxu0 }
  0xaf   :  { %v384_v57 = vadd.f32 %v383_v56, %v362_v55  ;;  %v402_v58 = vpop.f32.mrf.mxu1  ;;  %v366_v56 = vperm.slane %v828_v54, 4 }
  0xb1   :  { %v403_v59 = vadd.f32 %v402_v58, %v384_v57 }
  0xb3   :  { %602 = vst [vmem:[#allocation8] sm:$0xff] %v403_v59 }
  0xb6   :  { %v421_v49 = vpop.f32.mrf.mxu2  ;;  %v385_v62 = vpop.f32.mrf.mxu0 }
  0xb7   :  { %v422_v60 = vadd.f32 %v421_v49, %v363_v44  ;;  %v440_v61 = vpop.f32.mrf.mxu3  ;;  %v386_v63 = vadd.f32 %v385_v62, %v362_v55  ;;  %v404_v0 = vpop.f32.mrf.mxu1 }
  0xb9   :  { %v441_v34 = vadd.f32 %v440_v61, %v422_v60  ;;  %v405_v1 = vadd.f32 %v404_v0, %v386_v63  ;;  %v367_v63 = vperm.slane %v828_v54, 5 }
  0xbb   :  { %603 = vst [vmem:[#allocation8 + $0x8] sm:$0xff] %v441_v34 }
  0xbc   :  { %608 = vst [vmem:[#allocation8 + $0x30] sm:$0xff] %v405_v1 }
  0xbe   :  { %v423_v39 = vpop.f32.mrf.mxu2  ;;  %v388_v4 = vpop.f32.mrf.mxu0 }
  0xbf   :  { %v424_v2 = vadd.f32 %v423_v39, %v363_v44  ;;  %v442_v3 = vpop.f32.mrf.mxu3  ;;  %v389_v5 = vadd.f32 %v388_v4, %v362_v55  ;;  %v407_v6 = vpop.f32.mrf.mxu1 }
  0xc1   :  { %v443_v7 = vadd.f32 %v442_v3, %v424_v2  ;;  %v408_v8 = vadd.f32 %v407_v6, %v389_v5 }
  0xc3   :  { %609 = vst [vmem:[#allocation8 + $0x38] sm:$0xff] %v443_v7 }
  0xc4   :  { %614 = vst [vmem:[#allocation8 + $0x60] sm:$0xff] %v408_v8 }
  0xc6   :  { %v426_v9 = vpop.f32.mrf.mxu2  ;;  %v390_v12 = vpop.f32.mrf.mxu0 }
  0xc7   :  { %v427_v10 = vadd.f32 %v426_v9, %v363_v44  ;;  %v445_v11 = vpop.f32.mrf.mxu3  ;;  %v391_v13 = vadd.f32 %v390_v12, %v362_v55  ;;  %v409_v14 = vpop.f32.mrf.mxu1 }
  0xc9   :  { %v446_v15 = vadd.f32 %v445_v11, %v427_v10  ;;  %v410_v16 = vadd.f32 %v409_v14, %v391_v13 }
  0xcb   :  { %615 = vst [vmem:[#allocation8 + $0x68] sm:$0xff] %v446_v15 }
  0xcc   :  { %620 = vst [vmem:[#allocation8 + $0x90] sm:$0xff] %v410_v16 }
  0xce   :  { %v428_v18 = vpop.f32.mrf.mxu2  ;;  %v459_v21 = vpop.f32.mrf.mxu0 }
  0xcf   :  { %v429_v19 = vadd.f32 %v428_v18, %v363_v44  ;;  %v447_v20 = vpop.f32.mrf.mxu3  ;;  %v478_v22 = vpop.f32.mrf.mxu1  ;;  %v460_v24 = vadd.f32 %v459_v21, %v364_v17 }
  0xd1   :  { %v448_v23 = vadd.f32 %v447_v20, %v429_v19  ;;  %v479_v25 = vadd.f32 %v478_v22, %v460_v24 }
  0xd3   :  { %621 = vst [vmem:[#allocation8 + $0x98] sm:$0xff] %v448_v23 }
  0xd4   :  { %604 = vst [vmem:[#allocation8 + $0x10] sm:$0xff] %v479_v25 }
  0xd6   :  { %v497_v27 = vpop.f32.mrf.mxu2  ;;  %v461_v30 = vpop.f32.mrf.mxu0 }
  0xd7   :  { %v516_v28 = vpop.f32.mrf.mxu3  ;;  %v498_v29 = vadd.f32 %v497_v27, %v365_v26  ;;  %v480_v31 = vpop.f32.mrf.mxu1  ;;  %v462_v32 = vadd.f32 %v461_v30, %v364_v17 }
  0xd9   :  { %v517_v33 = vadd.f32 %v516_v28, %v498_v29  ;;  %v481_v35 = vadd.f32 %v480_v31, %v462_v32 }
  0xdb   :  { %605 = vst [vmem:[#allocation8 + $0x18] sm:$0xff] %v517_v33 }
  0xdc   :  { %610 = vst [vmem:[#allocation8 + $0x40] sm:$0xff] %v481_v35 }
  0xde   :  { %v499_v36 = vpop.f32.mrf.mxu2  ;;  %v464_v40 = vpop.f32.mrf.mxu0 }
  0xdf   :  { %v518_v37 = vpop.f32.mrf.mxu3  ;;  %v500_v38 = vadd.f32 %v499_v36, %v365_v26  ;;  %v483_v41 = vpop.f32.mrf.mxu1  ;;  %v465_v42 = vadd.f32 %v464_v40, %v364_v17 }
  0xe1   :  { %v519_v43 = vadd.f32 %v518_v37, %v500_v38  ;;  %v484_v45 = vadd.f32 %v483_v41, %v465_v42 }
  0xe3   :  { %611 = vst [vmem:[#allocation8 + $0x48] sm:$0xff] %v519_v43 }
  0xe4   :  { %616 = vst [vmem:[#allocation8 + $0x70] sm:$0xff] %v484_v45 }
  0xe6   :  { %v502_v46 = vpop.f32.mrf.mxu2  ;;  %v466_v50 = vpop.f32.mrf.mxu0 }
  0xe7   :  { %v521_v47 = vpop.f32.mrf.mxu3  ;;  %v503_v48 = vadd.f32 %v502_v46, %v365_v26  ;;  %v485_v51 = vpop.f32.mrf.mxu1  ;;  %v467_v52 = vadd.f32 %v466_v50, %v364_v17 }
  0xe9   :  { %v522_v53 = vadd.f32 %v521_v47, %v503_v48  ;;  %v486_v55 = vadd.f32 %v485_v51, %v467_v52 }
  0xeb   :  { %617 = vst [vmem:[#allocation8 + $0x78] sm:$0xff] %v522_v53 }
  0xec   :  { %622 = vst [vmem:[#allocation8 + $0xa0] sm:$0xff] %v486_v55 }
  0xee   :  { %v504_v57 = vpop.f32.mrf.mxu2  ;;  %v535_v44 = vpop.f32.mrf.mxu0 }
  0xef   :  { %v523_v58 = vpop.f32.mrf.mxu3  ;;  %v505_v59 = vadd.f32 %v504_v57, %v365_v26  ;;  %v554_v49 = vpop.f32.mrf.mxu1  ;;  %v536_v60 = vadd.f32 %v535_v44, %v366_v56 }
  0xf1   :  { %v524_v61 = vadd.f32 %v523_v58, %v505_v59  ;;  %v555_v62 = vadd.f32 %v554_v49, %v536_v60 }
  0xf3   :  { %623 = vst [vmem:[#allocation8 + $0xa8] sm:$0xff] %v524_v61 }
  0xf4   :  { %606 = vst [vmem:[#allocation8 + $0x20] sm:$0xff] %v555_v62 }
  0xf6   :  { %v573_v0 = vpop.f32.mrf.mxu2  ;;  %v537_v39 = vpop.f32.mrf.mxu0 }
  0xf7   :  { %v592_v34 = vpop.f32.mrf.mxu3  ;;  %v574_v1 = vadd.f32 %v573_v0, %v367_v63  ;;  %v556_v2 = vpop.f32.mrf.mxu1  ;;  %v538_v3 = vadd.f32 %v537_v39, %v366_v56 }
  0xf9   :  { %v593_v4 = vadd.f32 %v592_v34, %v574_v1  ;;  %v557_v5 = vadd.f32 %v556_v2, %v538_v3 }
  0xfb   :  { %607 = vst [vmem:[#allocation8 + $0x28] sm:$0xff] %v593_v4 }
  0xfc   :  { %612 = vst [vmem:[#allocation8 + $0x50] sm:$0xff] %v557_v5 }
  0xfe   :  { %v575_v6 = vpop.f32.mrf.mxu2  ;;  %v540_v9 = vpop.f32.mrf.mxu0 }
  0xff   :  { %v594_v7 = vpop.f32.mrf.mxu3  ;;  %v576_v8 = vadd.f32 %v575_v6, %v367_v63  ;;  %v559_v10 = vpop.f32.mrf.mxu1  ;;  %v541_v11 = vadd.f32 %v540_v9, %v366_v56 }
 0x101   :  { %v595_v12 = vadd.f32 %v594_v7, %v576_v8  ;;  %v560_v13 = vadd.f32 %v559_v10, %v541_v11 }
 0x103   :  { %613 = vst [vmem:[#allocation8 + $0x58] sm:$0xff] %v595_v12 }
 0x104   :  { %618 = vst [vmem:[#allocation8 + $0x80] sm:$0xff] %v560_v13 }
 0x106   :  { %v578_v54 = vpop.f32.mrf.mxu2  ;;  %v542_v16 = vpop.f32.mrf.mxu0 }
 0x107   :  { %v597_v14 = vpop.f32.mrf.mxu3  ;;  %v579_v15 = vadd.f32 %v578_v54, %v367_v63  ;;  %v543_v17 = vadd.f32 %v542_v16, %v366_v56  ;;  %v561_v19 = vpop.f32.mrf.mxu1 }
 0x109   :  { %v598_v18 = vadd.f32 %v597_v14, %v579_v15  ;;  %v562_v20 = vadd.f32 %v561_v19, %v543_v17 }
 0x10b   :  { %619 = vst [vmem:[#allocation8 + $0x88] sm:$0xff] %v598_v18 }
 0x10c   :  { %624 = vst [vmem:[#allocation8 + $0xb0] sm:$0xff] %v562_v20 }
 0x10e   :  { %v580_v21 = vpop.f32.mrf.mxu2 }
 0x10f   :  { %v581_v22 = vadd.f32 %v580_v21, %v367_v63  ;;  %v599_v23 = vpop.f32.mrf.mxu3 }
 0x111   :  { %v600_v24 = vadd.f32 %v599_v23, %v581_v22 }
 0x113   :  { %625 = vst [vmem:[#allocation8 + $0xb8] sm:$0xff] %v600_v24 }
 0x114   :  { %638 = dma.vmem_to_hbm [thread:$0]  %s631_s29, 3072, %s633_s5, [#allocation4], %s757_s20, %s757_s20, %s758_s21  }
 0x115   :  { %754 = dma.done.wait [#allocation4], 3072  }
 0x116   :  { %755 = vsyncadd [#allocation4], 4294964224 }
 0x117   :  { %643 = vsyncpa [#allocation3], 1 }
 0x118   :  { %644 = vsyncpa [#allocation6], 1 }
 0x119   :  { %645 = vsyncpa [#allocation4], 1 }

</bundles_post_ra>
